<compile_context>
chip_gen: v5e
topology: v5e:2x2
jax: 0.10.0
libtpu: 0.0.40
codegen_flags: <defaults>
</compile_context>

<pallas_src>
import functools

import jax
import jax.numpy as jnp
import numpy as np
from jax import lax
from jax.experimental import pallas as pl
from jax.experimental.pallas import tpu as pltpu


DEFAULT_ROW_TILE = 512            # rows per grid step, projection / fc+LN kernels
ATTN_Q_TILE = 256                 # target Lq rows per attention grid step
VMEM_LIMIT_BYTES = 48 * 1024 * 1024  # explicit scoped-VMEM limit (headroom on v7x 64 MiB)


def _row_tile(n, target=DEFAULT_ROW_TILE):
    """Row-tile size: whole array when small, else a multiple-of-8 tile."""
    return n if n <= target else target


def _q_tile(lq, target=ATTN_Q_TILE):
    """Lq tile for attention: keep >=128 rows per step (MXU fill) when tiling."""
    if lq <= target:
        return lq
    for t in (256, 128):
        if t <= target and lq % t == 0:
            return t
    return lq  # fallback: whole sequence per step


def _cast(x, dt):
    """Dtype cast that is a trace-time no-op when already in the target dtype."""
    return x if x.dtype == dt else x.astype(dt)


def _mosaic_params(dims):
    return pltpu.CompilerParams(dimension_semantics=dims,
                                vmem_limit_bytes=VMEM_LIMIT_BYTES)


# ----------------------------------------------------------------------------
# Kernel 1: fused Q/K/V projections  (y = x @ W^T + b, three of them, one call)
# ----------------------------------------------------------------------------
def _qkv_proj_kernel(q_ref, k_ref, v_ref,
                     wq_ref, wk_ref, wv_ref,
                     bq_ref, bk_ref, bv_ref,
                     qo_ref, ko_ref, vo_ref, *, mm_dtype):
    for x_ref, w_ref, b_ref, o_ref in (
        (q_ref, wq_ref, bq_ref, qo_ref),
        (k_ref, wk_ref, bk_ref, ko_ref),
        (v_ref, wv_ref, bv_ref, vo_ref),
    ):
        y = jnp.dot(_cast(x_ref[...], mm_dtype), _cast(w_ref[...], mm_dtype),
                    preferred_element_type=jnp.float32)
        o_ref[...] = (y + b_ref[...]).astype(o_ref.dtype)


def pallas_qkv_proj(q2d, k2d, v2d, wq_t, wk_t, wv_t, bq, bk, bv, *,
                    mm_dtype=jnp.float32, row_tile=DEFAULT_ROW_TILE):
    """q2d/k2d/v2d: (N, d_model); w*_t: (d_model, d_out) (already pre-cast); b*: (d_out,)."""
    n, d_model = q2d.shape
    d_qk = wq_t.shape[1]
    d_vv = wv_t.shape[1]
    tm = _row_tile(n, row_tile)

    def rows(d):
        return pl.BlockSpec((tm, d), lambda i: (i, 0))

    def pinned(shape):
        return pl.BlockSpec(shape, lambda i: (0, 0))

    kernel = functools.partial(_qkv_proj_kernel, mm_dtype=mm_dtype)
    return pl.pallas_call(
        kernel,
        out_shape=(
            jax.ShapeDtypeStruct((n, d_qk), jnp.float32),
            jax.ShapeDtypeStruct((n, d_qk), jnp.float32),
            jax.ShapeDtypeStruct((n, d_vv), jnp.float32),
        ),
        grid=(pl.cdiv(n, tm),),
        in_specs=[
            rows(d_model), rows(d_model), rows(d_model),
            pinned((d_model, d_qk)), pinned((d_model, d_qk)), pinned((d_model, d_vv)),
            pinned((1, d_qk)), pinned((1, d_qk)), pinned((1, d_vv)),
        ],
        out_specs=(rows(d_qk), rows(d_qk), rows(d_vv)),
        compiler_params=_mosaic_params(("parallel",)),
    )(q2d, k2d, v2d, wq_t, wk_t, wv_t,
      bq.reshape(1, d_qk), bk.reshape(1, d_qk), bv.reshape(1, d_vv))


# Fallback single linear (used only when len_q != len_k != len_v).
def _linear_kernel(x_ref, w_ref, b_ref, o_ref, *, mm_dtype):
    y = jnp.dot(_cast(x_ref[...], mm_dtype), _cast(w_ref[...], mm_dtype),
                preferred_element_type=jnp.float32)
    o_ref[...] = (y + b_ref[...]).astype(o_ref.dtype)


def pallas_linear(x, w_t, b, *, mm_dtype=jnp.float32, row_tile=DEFAULT_ROW_TILE):
    n, d_in = x.shape
    d_out = w_t.shape[1]
    tm = _row_tile(n, row_tile)
    kernel = functools.partial(_linear_kernel, mm_dtype=mm_dtype)
    return pl.pallas_call(
        kernel,
        out_shape=jax.ShapeDtypeStruct((n, d_out), jnp.float32),
        grid=(pl.cdiv(n, tm),),
        in_specs=[
            pl.BlockSpec((tm, d_in), lambda i: (i, 0)),
            pl.BlockSpec((d_in, d_out), lambda i: (0, 0)),
            pl.BlockSpec((1, d_out), lambda i: (0, 0)),
        ],
        out_specs=pl.BlockSpec((tm, d_out), lambda i: (i, 0)),
        compiler_params=_mosaic_params(("parallel",)),
    )(x, w_t, b.reshape(1, d_out))


# ----------------------------------------------------------------------------
# Kernel 2: scaled dot-product attention.
# Grid = (batch, Lq-tiles); all heads of one (batch, q-tile) per step.
# K/V blocks stay resident across the q-tile axis (constant index map).
# ----------------------------------------------------------------------------
def _attn_kernel(q_ref, k_ref, v_ref, o_ref, *attn_refs,
                 n_head, d_k, d_v, mm_dtype, approx_recip):
    a_ref = attn_refs[0] if attn_refs else None
    # NOTE: 1/temperature is folded into w_qs / b_qs on the host.
    q = q_ref[0]          # (tq, n_head*d_k)
    k = k_ref[0]          # (Lk, n_head*d_k)
    v = v_ref[0]          # (Lk, n_head*d_v)
    outs = []
    for h in range(n_head):        # static unroll, heads packed on the lane axis
        qh = _cast(q[:, h * d_k:(h + 1) * d_k], mm_dtype)
        kh = _cast(k[:, h * d_k:(h + 1) * d_k], mm_dtype)
        vh = _cast(v[:, h * d_v:(h + 1) * d_v], mm_dtype)
        # Contract the last dims directly — no materialized transpose through the XLU.
        s = lax.dot_general(qh, kh, (((1,), (1,)), ((), ())),
                            preferred_element_type=jnp.float32)
        s = s - jnp.max(s, axis=-1, keepdims=True)
        e = jnp.exp(s)
        den = jnp.sum(e, axis=-1, keepdims=True)
        if approx_recip:
            attn = e * pl.reciprocal(den, approx=True)   # EUP slot, loose path only
        else:
            attn = e / den                               # exact: strict module parity
        if a_ref is not None:
            a_ref[h, 0] = attn.astype(a_ref.dtype)       # full (tq, Lk) plane store
        outs.append(jnp.dot(_cast(attn, mm_dtype), vh,
                            preferred_element_type=jnp.float32))
    # Single lane-dense store of all heads (avoids per-head masked vst.msk stores).
    o_ref[0] = jnp.concatenate(outs, axis=-1).astype(o_ref.dtype)


def pallas_attention(qp, kp, vp, *, n_head, d_k, d_v,
                     mm_dtype=jnp.float32, return_attn=True,
                     attn_dtype=jnp.float32, approx_recip=False):
    """qp: (B, Lq, n_head*d_k), kp: (B, Lk, n_head*d_k), vp: (B, Lv, n_head*d_v).

    Returns out: (B, Lq, n_head*d_v) and (optionally) attn: (n_head, B, Lq, Lk),
    written head-major by the out_spec so the caller only needs a free reshape.
    For hot paths, pass return_attn=False (drops the O(n_head*B*L^2) HBM
    writeback) and/or attn_dtype=jnp.bfloat16 to halve it.
    """
    b, lq, _ = qp.shape
    _, lk, _ = kp.shape
    _, lv, _ = vp.shape
    tq = _q_tile(lq)
    n_qt = pl.cdiv(lq, tq)

    kernel = functools.partial(
        _attn_kernel, n_head=n_head, d_k=d_k, d_v=d_v,
        mm_dtype=mm_dtype, approx_recip=approx_recip)

    o_sds = jax.ShapeDtypeStruct((b, lq, n_head * d_v), jnp.float32)
    o_spec = pl.BlockSpec((1, tq, n_head * d_v), lambda i, j: (i, j, 0))
    in_specs = [
        pl.BlockSpec((1, tq, n_head * d_k), lambda i, j: (i, j, 0)),
        pl.BlockSpec((1, lk, n_head * d_k), lambda i, j: (i, 0, 0)),  # K resident over q tiles
        pl.BlockSpec((1, lv, n_head * d_v), lambda i, j: (i, 0, 0)),  # V resident over q tiles
    ]
    if return_attn:
        out_shape = (o_sds, jax.ShapeDtypeStruct((n_head, b, lq, lk), attn_dtype))
        out_specs = (o_spec,
                     pl.BlockSpec((n_head, 1, tq, lk), lambda i, j: (0, i, j, 0)))
    else:
        out_shape = o_sds
        out_specs = o_spec

    res = pl.pallas_call(
        kernel,
        out_shape=out_shape,
        grid=(b, n_qt),
        in_specs=in_specs,
        out_specs=out_specs,
        compiler_params=_mosaic_params(("parallel", "parallel")),
    )(qp, kp, vp)
    if return_attn:
        out, attn4 = res
        return out, attn4
    return res, None


# ----------------------------------------------------------------------------
# Kernel 3: fc projection + residual add + BertLayerNorm (TF-style eps)
# ----------------------------------------------------------------------------
def _fc_res_ln_kernel(x_ref, w_ref, b_ref, res_ref, g_ref, beta_ref, o_ref,
                      *, eps, mm_dtype):
    y = jnp.dot(_cast(x_ref[...], mm_dtype), _cast(w_ref[...], mm_dtype),
                preferred_element_type=jnp.float32)
    y = y + b_ref[...] + res_ref[...]
    u = jnp.mean(y, axis=-1, keepdims=True)
    s = jnp.mean((y - u) ** 2, axis=-1, keepdims=True)
    xn = (y - u) * lax.rsqrt(s + eps)      # rsqrt -> EUP slot, LN math stays f32
    o_ref[...] = (g_ref[...] * xn + beta_ref[...]).astype(o_ref.dtype)


def pallas_fc_residual_ln(x, w_t, b, residual, gamma, beta, *, eps=1e-12,
                          mm_dtype=jnp.float32, row_tile=DEFAULT_ROW_TILE):
    """x: (N, n_head*d_v), w_t: (n_head*d_v, d_model) (pre-cast), residual: (N, d_model)."""
    n, d_in = x.shape
    d_model = w_t.shape[1]
    tm = _row_tile(n, row_tile)
    kernel = functools.partial(_fc_res_ln_kernel, eps=eps, mm_dtype=mm_dtype)
    return pl.pallas_call(
        kernel,
        out_shape=jax.ShapeDtypeStruct((n, d_model), jnp.float32),
        grid=(pl.cdiv(n, tm),),
        in_specs=[
            pl.BlockSpec((tm, d_in), lambda i: (i, 0)),
            pl.BlockSpec((d_in, d_model), lambda i: (0, 0)),
            pl.BlockSpec((1, d_model), lambda i: (0, 0)),
            pl.BlockSpec((tm, d_model), lambda i: (i, 0)),
            pl.BlockSpec((1, d_model), lambda i: (0, 0)),
            pl.BlockSpec((1, d_model), lambda i: (0, 0)),
        ],
        out_specs=pl.BlockSpec((tm, d_model), lambda i: (i, 0)),
        compiler_params=_mosaic_params(("parallel",)),
    )(x, w_t, b.reshape(1, d_model), residual,
      gamma.reshape(1, d_model), beta.reshape(1, d_model))


# ----------------------------------------------------------------------------
# Full module forward (Pallas-backed).  No host-side transposes of activations.
# ----------------------------------------------------------------------------
def multi_head_attention(q, k, v, params, *, n_head, d_k, d_v,
                         mm_dtype=jnp.float32, return_attn=True,
                         approx_recip=False):
    sz_b, len_q, d_model = q.shape
    _, len_k, _ = k.shape
    _, len_v, _ = v.shape
    residual = q

    # Fold 1/temperature into the Q projection parameters (compile-time scale).
    inv_temp = float(1.0 / np.power(d_k, 0.5))
    # Pre-cast weights to mm_dtype on the host (bf16 path: halves pinned VMEM + DMA).
    wq_t = (params["w_qs"] * inv_temp).T.astype(mm_dtype)
    wk_t = params["w_ks"].T.astype(mm_dtype)
    wv_t = params["w_vs"].T.astype(mm_dtype)
    wf_t = params["w_fc"].T.astype(mm_dtype)
    bq = (params["b_qs"] * inv_temp).astype(jnp.float32)  # biases stay f32 (post-accumulate)

    q2 = q.reshape(-1, d_model)
    k2 = k.reshape(-1, d_model)
    v2 = v.reshape(-1, d_model)

    if len_q == len_k == len_v:
        qp, kp, vp = pallas_qkv_proj(
            q2, k2, v2, wq_t, wk_t, wv_t,
            bq, params["b_ks"], params["b_vs"],
            mm_dtype=mm_dtype)
    else:  # cross-attention with unequal lengths: separate row-tiled linears
        qp = pallas_linear(q2, wq_t, bq, mm_dtype=mm_dtype)
        kp = pallas_linear(k2, wk_t, params["b_ks"], mm_dtype=mm_dtype)
        vp = pallas_linear(v2, wv_t, params["b_vs"], mm_dtype=mm_dtype)

    # Heads stay packed along the lane axis -> only free reshapes, no transposes.
    qp = qp.reshape(sz_b, len_q, n_head * d_k)
    kp = kp.reshape(sz_b, len_k, n_head * d_k)
    vp = vp.reshape(sz_b, len_v, n_head * d_v)

    out, attn4 = pallas_attention(
        qp, kp, vp, n_head=n_head, d_k=d_k, d_v=d_v,
        mm_dtype=mm_dtype, return_attn=return_attn, approx_recip=approx_recip)

    final = pallas_fc_residual_ln(
        out.reshape(sz_b * len_q, n_head * d_v),
        wf_t, params["b_fc"],
        residual.reshape(-1, d_model),
        params["ln_w"], params["ln_b"],
        mm_dtype=mm_dtype)
    final = final.reshape(sz_b, len_q, d_model)

    attn = None
    if return_attn:
        # (n_head, B, Lq, Lk) -> (n_head*B, Lq, Lk): head-major, matches PyTorch.
        attn = attn4.reshape(n_head * sz_b, len_q, len_k)
    return final, attn


# ----------------------------------------------------------------------------
# Pure-JAX reference (mirrors the PyTorch forward, eval mode, mask=None)
# ----------------------------------------------------------------------------
def reference(q, k, v, params, *, n_head, d_k, d_v):
    sz_b, len_q, d_model = q.shape
    residual = q
    qp = q @ params["w_qs"].T + params["b_qs"]
    kp = k @ params["w_ks"].T + params["b_ks"]
    vp = v @ params["w_vs"].T + params["b_vs"]
    qh = qp.reshape(sz_b, len_q, n_head, d_k).transpose(2, 0, 1, 3).reshape(-1, len_q, d_k)
    kh = kp.reshape(sz_b, -1, n_head, d_k).transpose(2, 0, 1, 3).reshape(-1, k.shape[1], d_k)
    vh = vp.reshape(sz_b, -1, n_head, d_v).transpose(2, 0, 1, 3).reshape(-1, v.shape[1], d_v)
    s = jnp.einsum("bqd,bkd->bqk", qh, kh) / np.power(d_k, 0.5)
    attn = jax.nn.softmax(s, axis=-1)
    out = jnp.einsum("bqk,bkd->bqd", attn, vh)
    out = out.reshape(n_head, sz_b, len_q, d_v).transpose(1, 2, 0, 3).reshape(sz_b, len_q, -1)
    out = out @ params["w_fc"].T + params["b_fc"]
    x = out + residual
    u = x.mean(-1, keepdims=True)
    sv = ((x - u) ** 2).mean(-1, keepdims=True)
    x = (x - u) / jnp.sqrt(sv + 1e-12)
    return params["ln_w"] * x + params["ln_b"], attn


if __name__ == "__main__":
    # Small, deterministic config.
    n_head, d_model, d_k, d_v = 4, 32, 8, 8
    sz_b, seq_len = 2, 8

    key = jax.random.PRNGKey(0)
    keys = jax.random.split(key, 12)

    std_qk = np.sqrt(2.0 / (d_model + d_k))
    std_v = np.sqrt(2.0 / (d_model + d_v))
    std_fc = np.sqrt(2.0 / (n_head * d_v + d_model))  # xavier_normal_ for fc

    params = {
        "w_qs": (std_qk * jax.random.normal(keys[0], (n_head * d_k, d_model))).astype(jnp.float32),
        "b_qs": (0.01 * jax.random.normal(keys[1], (n_head * d_k,))).astype(jnp.float32),
        "w_ks": (std_qk * jax.random.normal(keys[2], (n_head * d_k, d_model))).astype(jnp.float32),
        "b_ks": (0.01 * jax.random.normal(keys[3], (n_head * d_k,))).astype(jnp.float32),
        "w_vs": (std_v * jax.random.normal(keys[4], (n_head * d_v, d_model))).astype(jnp.float32),
        "b_vs": (0.01 * jax.random.normal(keys[5], (n_head * d_v,))).astype(jnp.float32),
        "w_fc": (std_fc * jax.random.normal(keys[6], (d_model, n_head * d_v))).astype(jnp.float32),
        "b_fc": (0.01 * jax.random.normal(keys[7], (d_model,))).astype(jnp.float32),
        "ln_w": jnp.ones((d_model,), jnp.float32),
        "ln_b": jnp.zeros((d_model,), jnp.float32),
    }

    q = jax.random.normal(keys[8], (sz_b, seq_len, d_model), dtype=jnp.float32)
    k = jax.random.normal(keys[9], (sz_b, seq_len, d_model), dtype=jnp.float32)
    v = jax.random.normal(keys[10], (sz_b, seq_len, d_model), dtype=jnp.float32)

    ref_out, ref_attn = reference(q, k, v, params, n_head=n_head, d_k=d_k, d_v=d_v)

    # 1) f32 matmul operands, exact softmax division (default; strict module parity).
    #    Tolerance leaves margin for TPU MXU pass decomposition / transcendental
    #    differences between the Pallas kernels and the XLA reference.
    out, attn = multi_head_attention(q, k, v, params, n_head=n_head, d_k=d_k, d_v=d_v)
    out = jax.block_until_ready(out)
    attn = jax.block_until_ready(attn)
    np.testing.assert_allclose(np.asarray(out), np.asarray(ref_out), rtol=1e-2, atol=1e-2)
    np.testing.assert_allclose(np.asarray(attn), np.asarray(ref_attn), rtol=1e-2, atol=1e-2)

    # 2) bf16 MXU operands / f32 accumulation + approx EUP reciprocal
    #    (v5e/v6e/v7x fast path), loose check.
    out16, attn16 = multi_head_attention(q, k, v, params, n_head=n_head, d_k=d_k, d_v=d_v,
                                         mm_dtype=jnp.bfloat16, approx_recip=True)
    out16 = jax.block_until_ready(out16)
    attn16 = jax.block_until_ready(attn16)
    np.testing.assert_allclose(np.asarray(out16), np.asarray(ref_out), rtol=1e-1, atol=1e-1)
    np.testing.assert_allclose(np.asarray(attn16), np.asarray(ref_attn), rtol=1e-1, atol=1e-1)

    print("KERNEL_OK")
</pallas_src>

<mosaic_0001>
module attributes {stable_mosaic.version = 11 : i64} {
  func.func @_qkv_proj_kernel(%arg0: i32, %arg1: memref<16x32xf32, #tpu.memory_space<vmem>>, %arg2: memref<16x32xf32, #tpu.memory_space<vmem>>, %arg3: memref<16x32xf32, #tpu.memory_space<vmem>>, %arg4: memref<32x32xf32, #tpu.memory_space<vmem>>, %arg5: memref<32x32xf32, #tpu.memory_space<vmem>>, %arg6: memref<32x32xf32, #tpu.memory_space<vmem>>, %arg7: memref<1x32xf32, #tpu.memory_space<vmem>>, %arg8: memref<1x32xf32, #tpu.memory_space<vmem>>, %arg9: memref<1x32xf32, #tpu.memory_space<vmem>>, %arg10: memref<16x32xf32, #tpu.memory_space<vmem>>, %arg11: memref<16x32xf32, #tpu.memory_space<vmem>>, %arg12: memref<16x32xf32, #tpu.memory_space<vmem>>) attributes {dimension_semantics = [#tpu.dimension_semantics<parallel>], iteration_bounds = array<i64: 1>, scalar_prefetch = 0 : i64, scratch_operands = 0 : i64, tpu.core_type = #tpu.core_type<tc>, window_params = [{transform_indices = @transform_0, window_bounds = array<i64: 16, 32>}, {transform_indices = @transform_1, window_bounds = array<i64: 16, 32>}, {transform_indices = @transform_2, window_bounds = array<i64: 16, 32>}, {pipeline_mode = #tpu.pipeline_mode<synchronous>, transform_indices = @transform_3, window_bounds = array<i64: 32, 32>}, {pipeline_mode = #tpu.pipeline_mode<synchronous>, transform_indices = @transform_4, window_bounds = array<i64: 32, 32>}, {pipeline_mode = #tpu.pipeline_mode<synchronous>, transform_indices = @transform_5, window_bounds = array<i64: 32, 32>}, {pipeline_mode = #tpu.pipeline_mode<synchronous>, transform_indices = @transform_6, window_bounds = array<i64: 1, 32>}, {pipeline_mode = #tpu.pipeline_mode<synchronous>, transform_indices = @transform_7, window_bounds = array<i64: 1, 32>}, {pipeline_mode = #tpu.pipeline_mode<synchronous>, transform_indices = @transform_8, window_bounds = array<i64: 1, 32>}, {transform_indices = @transform_9, window_bounds = array<i64: 16, 32>}, {transform_indices = @transform_10, window_bounds = array<i64: 16, 32>}, {transform_indices = @transform_11, window_bounds = array<i64: 16, 32>}]} {
    %c0 = arith.constant 0 : index
    %c0_0 = arith.constant 0 : index
    %0 = vector.load %arg1[%c0, %c0_0] : memref<16x32xf32, #tpu.memory_space<vmem>>, vector<16x32xf32>
    %c0_1 = arith.constant 0 : index
    %c0_2 = arith.constant 0 : index
    %1 = vector.load %arg4[%c0_1, %c0_2] : memref<32x32xf32, #tpu.memory_space<vmem>>, vector<32x32xf32>
    %cst = arith.constant dense<0.000000e+00> : vector<16x32xf32>
    %2 = tpu.matmul %0, %1, %cst {dimension_numbers = #tpu.dot_dimension_numbers<[1], [0], [0], [1], [0, 0, 1, 1], [], []>} : vector<16x32xf32>, vector<32x32xf32>, vector<16x32xf32> -> vector<16x32xf32>
    %c0_3 = arith.constant 0 : index
    %c0_4 = arith.constant 0 : index
    %3 = vector.load %arg7[%c0_3, %c0_4] : memref<1x32xf32, #tpu.memory_space<vmem>>, vector<1x32xf32>
    %4 = vector.broadcast %3 : vector<1x32xf32> to vector<16x32xf32>
    %5 = arith.addf %2, %4 : vector<16x32xf32>
    %c0_5 = arith.constant 0 : index
    %c0_6 = arith.constant 0 : index
    %6 = vector.load %arg10[%c0_5, %c0_6] : memref<16x32xf32, #tpu.memory_space<vmem>>, vector<16x32xf32>
    tpu.vector_store %arg10[%c0_5, %c0_6], %5 {strides = array<i32>} : memref<16x32xf32, #tpu.memory_space<vmem>>, vector<16x32xf32>,
    %c0_7 = arith.constant 0 : index
    %c0_8 = arith.constant 0 : index
    %7 = vector.load %arg2[%c0_7, %c0_8] : memref<16x32xf32, #tpu.memory_space<vmem>>, vector<16x32xf32>
    %c0_9 = arith.constant 0 : index
    %c0_10 = arith.constant 0 : index
    %8 = vector.load %arg5[%c0_9, %c0_10] : memref<32x32xf32, #tpu.memory_space<vmem>>, vector<32x32xf32>
    %cst_11 = arith.constant dense<0.000000e+00> : vector<16x32xf32>
    %9 = tpu.matmul %7, %8, %cst_11 {dimension_numbers = #tpu.dot_dimension_numbers<[1], [0], [0], [1], [0, 0, 1, 1], [], []>} : vector<16x32xf32>, vector<32x32xf32>, vector<16x32xf32> -> vector<16x32xf32>
    %c0_12 = arith.constant 0 : index
    %c0_13 = arith.constant 0 : index
    %10 = vector.load %arg8[%c0_12, %c0_13] : memref<1x32xf32, #tpu.memory_space<vmem>>, vector<1x32xf32>
    %11 = vector.broadcast %10 : vector<1x32xf32> to vector<16x32xf32>
    %12 = arith.addf %9, %11 : vector<16x32xf32>
    %c0_14 = arith.constant 0 : index
    %c0_15 = arith.constant 0 : index
    %13 = vector.load %arg11[%c0_14, %c0_15] : memref<16x32xf32, #tpu.memory_space<vmem>>, vector<16x32xf32>
    tpu.vector_store %arg11[%c0_14, %c0_15], %12 {strides = array<i32>} : memref<16x32xf32, #tpu.memory_space<vmem>>, vector<16x32xf32>,
    %c0_16 = arith.constant 0 : index
    %c0_17 = arith.constant 0 : index
    %14 = vector.load %arg3[%c0_16, %c0_17] : memref<16x32xf32, #tpu.memory_space<vmem>>, vector<16x32xf32>
    %c0_18 = arith.constant 0 : index
    %c0_19 = arith.constant 0 : index
    %15 = vector.load %arg6[%c0_18, %c0_19] : memref<32x32xf32, #tpu.memory_space<vmem>>, vector<32x32xf32>
    %cst_20 = arith.constant dense<0.000000e+00> : vector<16x32xf32>
    %16 = tpu.matmul %14, %15, %cst_20 {dimension_numbers = #tpu.dot_dimension_numbers<[1], [0], [0], [1], [0, 0, 1, 1], [], []>} : vector<16x32xf32>, vector<32x32xf32>, vector<16x32xf32> -> vector<16x32xf32>
    %c0_21 = arith.constant 0 : index
    %c0_22 = arith.constant 0 : index
    %17 = vector.load %arg9[%c0_21, %c0_22] : memref<1x32xf32, #tpu.memory_space<vmem>>, vector<1x32xf32>
    %18 = vector.broadcast %17 : vector<1x32xf32> to vector<16x32xf32>
    %19 = arith.addf %16, %18 : vector<16x32xf32>
    %c0_23 = arith.constant 0 : index
    %c0_24 = arith.constant 0 : index
    %20 = vector.load %arg12[%c0_23, %c0_24] : memref<16x32xf32, #tpu.memory_space<vmem>>, vector<16x32xf32>
    tpu.vector_store %arg12[%c0_23, %c0_24], %19 {strides = array<i32>} : memref<16x32xf32, #tpu.memory_space<vmem>>, vector<16x32xf32>,
    return
  }
  func.func @transform_0(%arg0: i32) -> (i32, i32) {
    %c0_i32 = arith.constant 0 : i32
    %c0_i32_0 = arith.constant 0 : i32
    return %arg0, %c0_i32 : i32, i32
  }
  func.func @transform_1(%arg0: i32) -> (i32, i32) {
    %c0_i32 = arith.constant 0 : i32
    %c0_i32_0 = arith.constant 0 : i32
    return %arg0, %c0_i32 : i32, i32
  }
  func.func @transform_2(%arg0: i32) -> (i32, i32) {
    %c0_i32 = arith.constant 0 : i32
    %c0_i32_0 = arith.constant 0 : i32
    return %arg0, %c0_i32 : i32, i32
  }
  func.func @transform_3(%arg0: i32) -> (i32, i32) {
    %c0_i32 = arith.constant 0 : i32
    %c0_i32_0 = arith.constant 0 : i32
    %c0_i32_1 = arith.constant 0 : i32
    return %c0_i32, %c0_i32_0 : i32, i32
  }
  func.func @transform_4(%arg0: i32) -> (i32, i32) {
    %c0_i32 = arith.constant 0 : i32
    %c0_i32_0 = arith.constant 0 : i32
    %c0_i32_1 = arith.constant 0 : i32
    return %c0_i32, %c0_i32_0 : i32, i32
  }
  func.func @transform_5(%arg0: i32) -> (i32, i32) {
    %c0_i32 = arith.constant 0 : i32
    %c0_i32_0 = arith.constant 0 : i32
    %c0_i32_1 = arith.constant 0 : i32
    return %c0_i32, %c0_i32_0 : i32, i32
  }
  func.func @transform_6(%arg0: i32) -> (i32, i32) {
    %c0_i32 = arith.constant 0 : i32
    %c0_i32_0 = arith.constant 0 : i32
    %c0_i32_1 = arith.constant 0 : i32
    return %c0_i32, %c0_i32_0 : i32, i32
  }
  func.func @transform_7(%arg0: i32) -> (i32, i32) {
    %c0_i32 = arith.constant 0 : i32
    %c0_i32_0 = arith.constant 0 : i32
    %c0_i32_1 = arith.constant 0 : i32
    return %c0_i32, %c0_i32_0 : i32, i32
  }
  func.func @transform_8(%arg0: i32) -> (i32, i32) {
    %c0_i32 = arith.constant 0 : i32
    %c0_i32_0 = arith.constant 0 : i32
    %c0_i32_1 = arith.constant 0 : i32
    return %c0_i32, %c0_i32_0 : i32, i32
  }
  func.func @transform_9(%arg0: i32) -> (i32, i32) {
    %c0_i32 = arith.constant 0 : i32
    %c0_i32_0 = arith.constant 0 : i32
    return %arg0, %c0_i32 : i32, i32
  }
  func.func @transform_10(%arg0: i32) -> (i32, i32) {
    %c0_i32 = arith.constant 0 : i32
    %c0_i32_0 = arith.constant 0 : i32
    return %arg0, %c0_i32 : i32, i32
  }
  func.func @transform_11(%arg0: i32) -> (i32, i32) {
    %c0_i32 = arith.constant 0 : i32
    %c0_i32_0 = arith.constant 0 : i32
    return %arg0, %c0_i32 : i32, i32
  }
}

</mosaic_0001>

<bundles_post_ra>
// kernel: tpu_custom_call.1
= control target key start
LH: loop header
LB: loop body
LE: loop exit
PB: predicated region body
PF: predicated region fallthrough
CT: control target
= control target key end

     0   :  { %17 = vsyncpa [#allocation3], 0  ;;  %s710_s0 = inlined_call_operand.hbm [shape: f32[16,32], index: 0, kind: input, shape index: {}]   ;;  %s711_s1 = inlined_call_operand.hbm [shape: f32[16,32], index: 1, kind: input, shape index: {}]   ;;  %s712_s2 = inlined_call_operand.hbm [shape: f32[16,32], index: 2, kind: input, shape index: {}]   ;;  %s713_s3 = inlined_call_operand.hbm [shape: f32[32,32], index: 3, kind: input, shape index: {}]   ;;  %s714_s4 = inlined_call_operand.hbm [shape: f32[32,32], index: 4, kind: input, shape index: {}]   ;;  %s715_s5 = inlined_call_operand.hbm [shape: f32[32,32], index: 5, kind: input, shape index: {}]   ;;  %s716_s6 = inlined_call_operand.vmem [shape: f32[1,32], index: 6, kind: input, shape index: {}]   ;;  %s717_s7 = inlined_call_operand.vmem [shape: f32[1,32], index: 7, kind: input, shape index: {}]   ;;  %s718_s8 = inlined_call_operand.vmem [shape: f32[1,32], index: 8, kind: input, shape index: {}]   ;;  %s719_s9 = inlined_call_operand.hbm [shape: f32[16,32], index: 9, kind: output, shape index: {0}]   ;;  %s720_s10 = inlined_call_operand.hbm [shape: f32[16,32], index: 10, kind: output, shape index: {1}]   ;;  %s721_s11 = inlined_call_operand.hbm [shape: f32[16,32], index: 11, kind: output, shape index: {2}]  }
   0x1   :  { %18 = vsyncpa [#allocation6], 0 }
   0x2   :  { %19 = vsyncpa [#allocation9], 0 }
   0x3   :  { %20 = vsyncpa [#allocation12], 0 }
   0x4   :  { %21 = vsyncpa [#allocation4], 0 }
   0x5   :  { %22 = vsyncpa [#allocation15], 0  ;;  %s40_s19 = sshll.u32 %s711_s1, 4  ;;  %s564_s20 = smov [#allocation5]   ;;  %s41_s19 = int_to_ptr.hbm [resolvable:$true] %s40_s19 }
   0x6   :  { %s42_s21 = sshll.u32 %s564_s20, 4  ;;  %s66_s24 = sshll.u32 %s713_s3, 4  ;;  %s43_s21 = int_to_ptr.vmem [resolvable:$true] %s42_s21  ;;  %s67_s24 = int_to_ptr.hbm [resolvable:$true] %s66_s24 }
   0x7   :  { %s565_s25 = smov 128   ;;  %s566_s26 = smov 8  }
   0x8   :  { %48 = dma.hbm_to_vmem [thread:$0]  %s41_s19, 256, %s43_s21, [#allocation6], %s565_s25, %s565_s25, %s566_s26  }
   0x9   :  { %s567_s27 = smov [#allocation8]   ;;  %s27_s1 = sshll.u32 %s710_s0, 4  ;;  %s28_s1 = int_to_ptr.hbm [resolvable:$true] %s27_s1 }
   0xa   :  { %s68_s28 = sshll.u32 %s567_s27, 4  ;;  %s53_s13 = sshll.u32 %s712_s2, 4  ;;  %s69_s28 = int_to_ptr.vmem [resolvable:$true] %s68_s28  ;;  %s54_s13 = int_to_ptr.hbm [resolvable:$true] %s53_s13 }
   0xb   :  { %74 = dma.hbm_to_vmem [thread:$0]  %s67_s24, 512, %s69_s28, [#allocation9], %s565_s25, %s565_s25, %s566_s26  }
   0xc   :  { %s568_s14 = smov [#allocation2]   ;;  %s569_s16 = smov [#allocation7]  }
   0xd   :  { %s29_s15 = sshll.u32 %s568_s14, 4  ;;  %s55_s0 = sshll.u32 %s569_s16, 4  ;;  %s30_s15 = int_to_ptr.vmem [resolvable:$true] %s29_s15  ;;  %s56_s0 = int_to_ptr.vmem [resolvable:$true] %s55_s0 }
   0xe   :  { %35 = dma.hbm_to_vmem [thread:$0]  %s28_s1, 256, %s30_s15, [#allocation3], %s565_s25, %s565_s25, %s566_s26  }
   0xf   :  { %s79_s19 = sshll.u32 %s714_s4, 4  ;;  %s92_s21 = sshll.u32 %s715_s5, 4  ;;  %s80_s19 = int_to_ptr.hbm [resolvable:$true] %s79_s19  ;;  %s93_s21 = int_to_ptr.hbm [resolvable:$true] %s92_s21 }
  0x10   :  { %61 = dma.hbm_to_vmem [thread:$0]  %s54_s13, 256, %s56_s0, [#allocation6], %s565_s25, %s565_s25, %s566_s26  }
  0x11   :  { %s570_s22 = smov [#allocation10]   ;;  %s571_s24 = smov [#allocation11]  }
  0x12   :  { %s81_s23 = sshll.u32 %s570_s22, 4  ;;  %s94_s4 = sshll.u32 %s571_s24, 4  ;;  %s82_s23 = int_to_ptr.vmem [resolvable:$true] %s81_s23  ;;  %s95_s4 = int_to_ptr.vmem [resolvable:$true] %s94_s4 }
  0x13   :  { %87 = dma.hbm_to_vmem [thread:$0]  %s80_s19, 512, %s82_s23, [#allocation9], %s565_s25, %s565_s25, %s566_s26  }
  0x14   :  { %100 = dma.hbm_to_vmem [thread:$0]  %s93_s21, 512, %s95_s4, [#allocation12], %s565_s25, %s565_s25, %s566_s26  }
  0x15   :  { %552 = dma.done.wait [#allocation3], 256  }
  0x16   :  { %553 = vsyncadd [#allocation3], 4294967040 }
  0x17   :  { %554 = dma.done.wait [#allocation6], 512  }
  0x18   :  { %555 = vsyncadd [#allocation6], 4294966784 }
  0x19   :  { %556 = dma.done.wait [#allocation9], 1024  }
  0x1a   :  { %557 = vsyncadd [#allocation9], 4294966272 }
  0x1b   :  { %558 = dma.done.wait [#allocation12], 512  }
  0x1c   :  { %559 = vsyncadd [#allocation12], 4294966784  ;;  %v219_v0 = vld [vmem:[#allocation11 + $0x18] sm:$0xff]  ;;  %v218_v1 = vld [vmem:[#allocation11 + $0x10] sm:$0xff]  ;;  %vm141_vm0 = vcmask 261120   ;;  %s572_s3 = smov [#allocation13]  }
  0x1d   :  { %242 = vmatpush.msra.mxu2 %v219_v0  ;;  %v178_v2 = vld [vmem:[#allocation10 + $0x18] sm:$0xff]  ;;  %v177_v3 = vld [vmem:[#allocation10 + $0x10] sm:$0xff]  ;;  %v217_v4 = vld [vmem:[#allocation11 + $0x8] sm:$0xff]  ;;  %s259_s12 = sshll.u32 %s572_s3, 4  ;;  %s573_s15 = smov [#allocation14]   ;;  %s260_s12 = int_to_ptr.vmem [resolvable:$true] %s259_s12 }
  0x1e   :  { %201 = vmatpush.msra.mxu1 %v178_v2  ;;  %v136_v5 = vld [vmem:[#allocation8 + $0x18] sm:$0xff]  ;;  %v176_v6 = vld [vmem:[#allocation10 + $0x8] sm:$0xff]  ;;  %v135_v7 = vld [vmem:[#allocation8 + $0x10] sm:$0xff]  ;;  %s272_s16 = sshll.u32 %s573_s15, 4  ;;  %s274_s17 = sshll.u32 %s720_s10, 4  ;;  %s273_s16 = int_to_ptr.vmem [resolvable:$true] %s272_s16  ;;  %s275_s17 = int_to_ptr.hbm [resolvable:$true] %s274_s17 }
  0x1f   :  { %243 = vmatpush.msra.mxu2 %v218_v1  ;;  %318 = vmatpush.msra.mxu3 %v136_v5  ;;  %v216_v8 = vld [vmem:[#allocation11] sm:$0xff]  ;;  %v134_v9 = vld [vmem:[#allocation8 + $0x8] sm:$0xff]  ;;  %v214_v10 = vld [vmem:[#allocation7] sm:$0xff]  ;;  %s287_s10 = sshll.u32 %s721_s11, 4  ;;  %s288_s10 = int_to_ptr.hbm [resolvable:$true] %s287_s10 }
  0x20   :  { %202 = vmatpush.msra.mxu1 %v177_v3  ;;  %160 = vmatpush.msra.mxu0 %v136_v5  ;;  %v175_v11 = vld [vmem:[#allocation10] sm:$0xff]  ;;  %v132_v14 = vld [vmem:[#allocation2 + $0x8] sm:$0xff]  ;;  %v131_v15 = vld [vmem:[#allocation2] sm:$0xff] }
  0x21   :  { %244 = vmatpush.msra.mxu2 %v217_v4  ;;  %319 = vmatpush.msra.mxu3 %v135_v7  ;;  %v173_v12 = vld [vmem:[#allocation5] sm:$0xff]  ;;  %v215_v16 = vld [vmem:[#allocation7 + $0x8] sm:$0xff]  ;;  %v174_v17 = vld [vmem:[#allocation5 + $0x8] sm:$0xff] }
  0x22   :  { %203 = vmatpush.msra.mxu1 %v176_v6  ;;  %v133_v13 = vld [vmem:[#allocation8] sm:$0xff]  ;;  %161 = vmatpush.msra.mxu0 %v135_v7  ;;  %v333_v18 = vld [vmem:[%s717_s7] ss:$0 sm:$0xff]  ;;  %s261_s7 = sshll.u32 %s719_s9, 4  ;;  %s262_s7 = int_to_ptr.hbm [resolvable:$true] %s261_s7 }
  0x23   :  { %245 = vmatpush.msra.mxu2 %v216_v8  ;;  %320 = vmatpush.msra.mxu3 %v134_v9  ;;  %v335_v21 = vld [vmem:[%s716_s6] ss:$0 sm:$0xff] }
  0x24   :  { %316 = vmatmul.msk.f32.vlgmr.msra.gmra.mxu2 %vm141_vm0, %v214_v10  ;;  %204 = vmatpush.msra.mxu1 %v175_v11  ;;  %v334_v22 = vld [vmem:[%s718_s8] ss:$0 sm:$0xff]  ;;  %s574_s8 = smov [#allocation16]  }
  0x25   :  { %314 = vmatmul.msk.f32.vlgmr.msra.gmra.mxu1 %vm141_vm0, %v173_v12  ;;  %321 = vmatpush.msra.mxu3 %v133_v13  ;;  %s285_s9 = sshll.u32 %s574_s8, 4  ;;  %s286_s9 = int_to_ptr.vmem [resolvable:$true] %s285_s9 }
  0x26   :  { %313 = vmatmul.msk.f32.vlgmr.msra.gmra.mxu3 %vm141_vm0, %v132_v14  ;;  %162 = vmatpush.msra.mxu0 %v134_v9 }
  0x28   :  { %163 = vmatpush.msra.mxu0 %v133_v13 }
  0x29   :  { %312 = vmatmul.msk.f32.vlgmr.msra.gmra.mxu0 %vm141_vm0, %v131_v15 }
  0x2c   :  { %317 = vmatmul.msk.f32.gmra.mxu2 %vm141_vm0, %v215_v16 }
  0x2d   :  { %315 = vmatmul.msk.f32.gmra.mxu1 %vm141_vm0, %v174_v17 }
  0xa2   :  { %v206_v19 = vpop.f32.mrf.mxu1 }
  0xa3   :  { %v207_v20 = vadd.f32 %v333_v18, %v206_v19 }
  0xa5   :  { %212 = vst.msk [vmem:[#allocation14] sm:$0xff] %vm141_vm0, %v207_v20 }
  0xa6   :  { %v165_v23 = vpop.f32.mrf.mxu0 }
  0xa7   :  { %v247_v24 = vpop.f32.mrf.mxu2  ;;  %v166_v25 = vadd.f32 %v335_v21, %v165_v23 }
  0xa8   :  { %v248_v26 = vadd.f32 %v334_v22, %v247_v24 }
  0xa9   :  { %171 = vst.msk [vmem:[#allocation13] sm:$0xff] %vm141_vm0, %v166_v25  ;;  %v168_v27 = vpop.f32.mrf.mxu3 }
  0xaa   :  { %253 = vst.msk [vmem:[#allocation16] sm:$0xff] %vm141_vm0, %v248_v26  ;;  %v209_v28 = vpop.f32.mrf.mxu1  ;;  %v169_v29 = vadd.f32 %v335_v21, %v168_v27 }
  0xab   :  { %v210_v30 = vadd.f32 %v333_v18, %v209_v28 }
  0xac   :  { %172 = vst.msk [vmem:[#allocation13 + $0x8] sm:$0xff] %vm141_vm0, %v169_v29 }
  0xad   :  { %213 = vst.msk [vmem:[#allocation14 + $0x8] sm:$0xff] %vm141_vm0, %v210_v30  ;;  %267 = dma.vmem_to_hbm [thread:$0]  %s260_s12, 256, %s262_s7, [#allocation4], %s565_s25, %s565_s25, %s566_s26  }
  0xae   :  { %280 = dma.vmem_to_hbm [thread:$0]  %s273_s16, 256, %s275_s17, [#allocation15], %s565_s25, %s565_s25, %s566_s26  }
  0xaf   :  { %v250_v31 = vpop.f32.mrf.mxu2 }
  0xb0   :  { %v251_v32 = vadd.f32 %v334_v22, %v250_v31 }
  0xb2   :  { %254 = vst.msk [vmem:[#allocation16 + $0x8] sm:$0xff] %vm141_vm0, %v251_v32 }
  0xb3   :  { %293 = dma.vmem_to_hbm [thread:$0]  %s286_s9, 256, %s288_s10, [#allocation15], %s565_s25, %s565_s25, %s566_s26  }
  0xb4   :  { %560 = dma.done.wait [#allocation4], 256  }
  0xb5   :  { %561 = vsyncadd [#allocation4], 4294967040 }
  0xb6   :  { %562 = dma.done.wait [#allocation15], 512  }
  0xb7   :  { %563 = vsyncadd [#allocation15], 4294966784 }
  0xb8   :  { %306 = vsyncpa [#allocation3], 1 }
  0xb9   :  { %307 = vsyncpa [#allocation6], 1 }
  0xba   :  { %308 = vsyncpa [#allocation9], 1 }
  0xbb   :  { %309 = vsyncpa [#allocation12], 1 }
  0xbc   :  { %310 = vsyncpa [#allocation4], 1 }
  0xbd   :  { %311 = vsyncpa [#allocation15], 1 }

</bundles_post_ra>
